<compile_context>
chip_gen: v5e
topology: v5e:2x2
jax: 0.10.0
libtpu: 0.0.40
codegen_flags: <defaults>
</compile_context>

<pallas_src>
import functools

import numpy as np
import jax
import jax.numpy as jnp
from jax.experimental import pallas as pl
from jax.experimental.pallas import tpu as pltpu

LANES = 128            # lane width (last dim of every tile)
MAX_BLOCK_ROWS = 512   # sublane rows per grid step (512*128 = 65536 samples)

_T_SCALE = np.float32(1.5 * np.pi)


def swiss_roll_kernel(noise_ref, u_ref, e0_ref, e1_ref, x0_ref, x1_ref):
    # noise_ref : SMEM (1,)  float32   the nn.Parameter(noise) value
    # u_ref     : VMEM (block_rows, LANES)  U[0,1) per sample
    # e0_ref    : VMEM (block_rows, LANES)  N(0,1) for coordinate 0
    # e1_ref    : VMEM (block_rows, LANES)  N(0,1) for coordinate 1
    # x0_ref    : VMEM (block_rows, LANES)  first swiss-roll coordinate
    # x1_ref    : VMEM (block_rows, LANES)  second swiss-roll coordinate
    t = _T_SCALE * (1.0 + 2.0 * u_ref[...])          # VPU
    noise = noise_ref[0]
    x0_ref[...] = t * jnp.cos(t) + noise * e0_ref[...]   # EUP cos + VPU fma
    x1_ref[...] = t * jnp.sin(t) + noise * e1_ref[...]   # EUP sin + VPU fma


@functools.partial(jax.jit, static_argnums=(2,))
def swiss_roll_forward(noise_p, key, batch_size):
    """Sample `batch_size` swiss-roll points -> (batch_size, 2) float32."""
    n = int(batch_size)

    # ---- adaptive tiling (all shapes are static; batch_size is static) ----
    rows = -(-n // LANES)                      # ceil(n / 128) sample rows
    rows8 = max(8, -(-rows // 8) * 8)          # pad only to the (8,128) minimum
    grid_n = -(-rows8 // MAX_BLOCK_ROWS)       # enough steps to cap block size
    if grid_n > 1 and grid_n % 2:
        grid_n += 1                            # even step count for v7x megacore
    per_step = -(-rows8 // grid_n)
    block_rows = -(-per_step // 8) * 8         # multiple of 8 sublanes
    rows_pad = grid_n * block_rows

    # ---- randoms generated outside the kernel (portable everywhere) ----
    ku, k0, k1 = jax.random.split(key, 3)
    u = jax.random.uniform(ku, (rows_pad, LANES), dtype=jnp.float32)
    e0 = jax.random.normal(k0, (rows_pad, LANES), dtype=jnp.float32)
    e1 = jax.random.normal(k1, (rows_pad, LANES), dtype=jnp.float32)
    noise_arr = jnp.asarray(noise_p, dtype=jnp.float32).reshape(1)

    plane = jax.ShapeDtypeStruct((rows_pad, LANES), jnp.float32)
    tile = pl.BlockSpec((block_rows, LANES), lambda i: (i, 0))

    x0, x1 = pl.pallas_call(
        swiss_roll_kernel,
        out_shape=(plane, plane),
        grid=(grid_n,),
        in_specs=[
            pl.BlockSpec(memory_space=pltpu.MemorySpace.SMEM),  # noise scalar
            tile,   # u
            tile,   # e0
            tile,   # e1
        ],
        out_specs=(tile, tile),
        compiler_params=pltpu.CompilerParams(
            dimension_semantics=("parallel",)),
    )(noise_arr, u, e0, e1)

    x0 = x0.reshape(-1)[:n]
    x1 = x1.reshape(-1)[:n]
    return jnp.stack([x0, x1], axis=-1)        # (n, 2) float32


if __name__ == "__main__":
    batch_size = 256           # small cfg.data.batch_size; exercises the kernel
    noise = 0.5                # nn.Parameter init value
    key = jax.random.PRNGKey(0)

    out = jax.block_until_ready(
        swiss_roll_forward(jnp.float32(noise), key, batch_size))
    assert out.shape == (batch_size, 2) and out.dtype == jnp.float32
    assert bool(jnp.all(jnp.isfinite(out)))

    # With noise = 0 every sample must satisfy (x0, x1) = (t cos t, t sin t)
    # with t = |x| in [1.5*pi, 4.5*pi].
    clean = jax.block_until_ready(
        swiss_roll_forward(jnp.float32(0.0), key, batch_size))
    clean_np = np.asarray(clean, dtype=np.float64)
    t_rec = np.hypot(clean_np[:, 0], clean_np[:, 1])
    assert np.all(t_rec >= 1.5 * np.pi - 1e-3)
    assert np.all(t_rec <= 4.5 * np.pi + 1e-3)
    np.testing.assert_allclose(clean_np[:, 0], t_rec * np.cos(t_rec), atol=5e-3)
    np.testing.assert_allclose(clean_np[:, 1], t_rec * np.sin(t_rec), atol=5e-3)

    # Same key -> same (u, eps) draws, so (out - clean)/noise recovers eps.
    eps_rec = (np.asarray(out, dtype=np.float64) - clean_np) / noise
    assert abs(eps_rec.mean()) < 0.2
    assert 0.8 < eps_rec.std() < 1.2

    print("KERNEL_OK")
</pallas_src>

<mosaic_0001>
module attributes {stable_mosaic.version = 11 : i64} {
  func.func @swiss_roll_kernel(%arg0: i32, %arg1: memref<1xf32, #tpu.memory_space<smem>>, %arg2: memref<8x128xf32, #tpu.memory_space<vmem>>, %arg3: memref<8x128xf32, #tpu.memory_space<vmem>>, %arg4: memref<8x128xf32, #tpu.memory_space<vmem>>, %arg5: memref<8x128xf32, #tpu.memory_space<vmem>>, %arg6: memref<8x128xf32, #tpu.memory_space<vmem>>) attributes {dimension_semantics = [#tpu.dimension_semantics<parallel>], iteration_bounds = array<i64: 1>, scalar_prefetch = 0 : i64, scratch_operands = 0 : i64, tpu.core_type = #tpu.core_type<tc>, window_params = [{transform_indices = @transform_0, window_bounds = array<i64: 1>}, {transform_indices = @transform_1, window_bounds = array<i64: 8, 128>}, {transform_indices = @transform_2, window_bounds = array<i64: 8, 128>}, {transform_indices = @transform_3, window_bounds = array<i64: 8, 128>}, {transform_indices = @transform_4, window_bounds = array<i64: 8, 128>}, {transform_indices = @transform_5, window_bounds = array<i64: 8, 128>}]} {
    %c0 = arith.constant 0 : index
    %c0_0 = arith.constant 0 : index
    %0 = vector.load %arg2[%c0, %c0_0] : memref<8x128xf32, #tpu.memory_space<vmem>>, vector<8x128xf32>
    %cst = arith.constant 2.000000e+00 : f32
    %1 = vector.broadcast %cst : f32 to vector<8x128xf32>
    %2 = arith.mulf %1, %0 : vector<8x128xf32>
    %cst_1 = arith.constant 1.000000e+00 : f32
    %3 = vector.broadcast %cst_1 : f32 to vector<8x128xf32>
    %4 = arith.addf %3, %2 : vector<8x128xf32>
    %cst_2 = arith.constant 4.71238899 : f32
    %5 = vector.broadcast %cst_2 : f32 to vector<8x128xf32>
    %6 = arith.mulf %5, %4 : vector<8x128xf32>
    %c0_3 = arith.constant 0 : index
    %7 = memref.load %arg1[%c0_3] : memref<1xf32, #tpu.memory_space<smem>>
    %8 = math.cos %6 : vector<8x128xf32>
    %9 = arith.mulf %6, %8 : vector<8x128xf32>
    %c0_4 = arith.constant 0 : index
    %c0_5 = arith.constant 0 : index
    %10 = vector.load %arg3[%c0_4, %c0_5] : memref<8x128xf32, #tpu.memory_space<vmem>>, vector<8x128xf32>
    %11 = vector.broadcast %7 : f32 to vector<8x128xf32>
    %12 = arith.mulf %11, %10 : vector<8x128xf32>
    %13 = arith.addf %9, %12 : vector<8x128xf32>
    %c0_6 = arith.constant 0 : index
    %c0_7 = arith.constant 0 : index
    %14 = vector.load %arg5[%c0_6, %c0_7] : memref<8x128xf32, #tpu.memory_space<vmem>>, vector<8x128xf32>
    tpu.vector_store %arg5[%c0_6, %c0_7], %13 {strides = array<i32>} : memref<8x128xf32, #tpu.memory_space<vmem>>, vector<8x128xf32>,
    %15 = math.sin %6 : vector<8x128xf32>
    %16 = arith.mulf %6, %15 : vector<8x128xf32>
    %c0_8 = arith.constant 0 : index
    %c0_9 = arith.constant 0 : index
    %17 = vector.load %arg4[%c0_8, %c0_9] : memref<8x128xf32, #tpu.memory_space<vmem>>, vector<8x128xf32>
    %18 = vector.broadcast %7 : f32 to vector<8x128xf32>
    %19 = arith.mulf %18, %17 : vector<8x128xf32>
    %20 = arith.addf %16, %19 : vector<8x128xf32>
    %c0_10 = arith.constant 0 : index
    %c0_11 = arith.constant 0 : index
    %21 = vector.load %arg6[%c0_10, %c0_11] : memref<8x128xf32, #tpu.memory_space<vmem>>, vector<8x128xf32>
    tpu.vector_store %arg6[%c0_10, %c0_11], %20 {strides = array<i32>} : memref<8x128xf32, #tpu.memory_space<vmem>>, vector<8x128xf32>,
    return
  }
  func.func @transform_0(%arg0: i32) -> i32 {
    %c0_i32 = arith.constant 0 : i32
    %c0_i32_0 = arith.constant 0 : i32
    return %c0_i32 : i32
  }
  func.func @transform_1(%arg0: i32) -> (i32, i32) {
    %c0_i32 = arith.constant 0 : i32
    %c0_i32_0 = arith.constant 0 : i32
    return %arg0, %c0_i32 : i32, i32
  }
  func.func @transform_2(%arg0: i32) -> (i32, i32) {
    %c0_i32 = arith.constant 0 : i32
    %c0_i32_0 = arith.constant 0 : i32
    return %arg0, %c0_i32 : i32, i32
  }
  func.func @transform_3(%arg0: i32) -> (i32, i32) {
    %c0_i32 = arith.constant 0 : i32
    %c0_i32_0 = arith.constant 0 : i32
    return %arg0, %c0_i32 : i32, i32
  }
  func.func @transform_4(%arg0: i32) -> (i32, i32) {
    %c0_i32 = arith.constant 0 : i32
    %c0_i32_0 = arith.constant 0 : i32
    return %arg0, %c0_i32 : i32, i32
  }
  func.func @transform_5(%arg0: i32) -> (i32, i32) {
    %c0_i32 = arith.constant 0 : i32
    %c0_i32_0 = arith.constant 0 : i32
    return %arg0, %c0_i32 : i32, i32
  }
}

</mosaic_0001>

<bundles_post_ra>
// kernel: swiss_roll_forward.3
= control target key start
LH: loop header
LB: loop body
LE: loop exit
PB: predicated region body
PF: predicated region fallthrough
CT: control target
= control target key end

     0   :  { %v366_v15 = vmov 683565275   ;;  %v367_v17 = vmov 2475754826   ;;  %v368_v19 = vmov 2131351028   ;;  %s469_s1 = inlined_call_operand.vmem [shape: f32[8,128], index: 1, kind: input, shape index: {}]   ;;  %s470_s0 = inlined_call_operand.<no memory space> [shape: f32[1], index: 0, kind: input, shape index: {}]   ;;  %s471_s2 = inlined_call_operand.vmem [shape: f32[8,128], index: 2, kind: input, shape index: {}]   ;;  %s472_s3 = inlined_call_operand.vmem [shape: f32[8,128], index: 3, kind: input, shape index: {}]   ;;  %s473_s4 = inlined_call_operand.vmem [shape: f32[8,128], index: 4, kind: output, shape index: {0}]   ;;  %s474_s5 = inlined_call_operand.vmem [shape: f32[8,128], index: 5, kind: output, shape index: {1}]  }
   0x1   :  { %v20_v0 = vld [vmem:[%s469_s1] sm:$0xff]  ;;  %v369_v21 = vmov 2102212464   ;;  %v370_v23 = vmov 920167782  }
   0x2   :  { %v21_v1 = vmul.f32 2.0, %v20_v0  ;;  %v371_v29 = vmov 1326507024  }
   0x4   :  { %v22_v2 = vadd.f32 1.0, %v21_v1 }
   0x6   :  { %v406_v3 = vmul.f32 4.712389, %v22_v2 }
   0x8   :  { %v28_v4 = vand.u32 2139095040, %v406_v3  ;;  %v25_v6 = vand.u32 2147483647, %v406_v3  ;;  %vm27_vm12 = vcmp.lt.s32.totalorder %v406_v3, 0 }
   0xa   :  { %v29_v5 = vshrl.u32 %v28_v4, 23  ;;  %v32_v9 = vand.u32 8388607, %v25_v6  ;;  %v372_v4 = vmov 0   ;;  %vm26_vm13 = vcmp.le.f32.partialorder %v25_v6, 0.7853982 }
   0xc   :  { %v353_v7 = vadd.s32 4294967169, %v29_v5  ;;  %v33_v12 = vor.u32 8388608, %v32_v9 }
   0xe   :  { %v35_v8 = vadd.s32 1, %v353_v7  ;;  %v415_v31 = vshll.u32 %v33_v12, 8 }
  0x10   :  { %vm36_vm0 = vcmp.gt.s32.totalorder %v35_v8, 0  ;;  %v74_v43 = vand.u32 65535, %v415_v31  ;;  %v75_v44 = vshrl.u32 %v415_v31, 16 }
  0x11   :  { %v37_v10 = vsel %vm36_vm0, %v35_v8, 0 }
  0x12   :  { %v39_v11 = vand.u32 31, %v37_v10  ;;  %v412_v13 = vshrl.u32 %v37_v10, 5 }
  0x14   :  { %v40_v14 = vsub.s32 32, %v39_v11  ;;  %v42_v16 = vshll.u32 %v366_v15, %v39_v11  ;;  %v45_v18 = vshll.u32 %v367_v17, %v39_v11  ;;  %v48_v20 = vshll.u32 %v368_v19, %v39_v11 }
  0x15   :  { %v51_v22 = vshll.u32 %v369_v21, %v39_v11  ;;  %v54_v24 = vshll.u32 %v370_v23, %v39_v11  ;;  %vm57_vm1 = vcmp.lt.s32.totalorder %v412_v13, 1  ;;  %vm60_vm2 = vcmp.lt.s32.totalorder %v412_v13, 4 }
  0x16   :  { %v43_v25 = vshrl.u32 %v367_v17, %v40_v14  ;;  %v46_v26 = vshrl.u32 %v368_v19, %v40_v14  ;;  %v49_v27 = vshrl.u32 %v369_v21, %v40_v14  ;;  %v52_v28 = vshrl.u32 %v370_v23, %v40_v14 }
  0x17   :  { %v55_v30 = vshrl.u32 %v371_v29, %v40_v14  ;;  %vm59_vm3 = vcmp.lt.s32.totalorder %v412_v13, 3  ;;  %vm58_vm4 = vcmp.lt.s32.totalorder %v412_v13, 2  ;;  %v41_v51 = vshrl.u32 %v366_v15, %v40_v14 }
  0x18   :  { %v44_v32 = vor.u32 %v43_v25, %v42_v16  ;;  %v47_v33 = vor.u32 %v46_v26, %v45_v18  ;;  %v50_v34 = vor.u32 %v49_v27, %v48_v20  ;;  %v53_v35 = vor.u32 %v52_v28, %v51_v22 }
  0x19   :  { %v56_v36 = vor.u32 %v55_v30, %v54_v24 }
  0x1a   :  { %v65_v37 = vsel %vm57_vm1, %v44_v32, %v47_v33  ;;  %v69_v38 = vsel %vm57_vm1, %v47_v33, %v50_v34  ;;  %v66_v39 = vsel %vm60_vm2, %v53_v35, 920167782  ;;  %v61_v0 = vsel %vm57_vm1, %v41_v51, %v44_v32 }
  0x1b   :  { %v70_v40 = vsel %vm60_vm2, %v56_v36, 1326507024  ;;  %v67_v41 = vsel %vm59_vm3, %v50_v34, %v66_v39  ;;  %v62_v2 = vsel %vm60_vm2, %v50_v34, 2102212464 }
  0x1c   :  { %v71_v42 = vsel %vm59_vm3, %v53_v35, %v70_v40  ;;  %v68_v45 = vsel %vm58_vm4, %v65_v37, %v67_v41  ;;  %v63_v15 = vsel %vm59_vm3, %v47_v33, %v62_v2 }
  0x1d   :  { %v72_v46 = vsel %vm58_vm4, %v69_v38, %v71_v42  ;;  %v98_v49 = vand.u32 65535, %v68_v45  ;;  %v99_v50 = vshrl.u32 %v68_v45, 16  ;;  %v64_v23 = vsel %vm58_vm4, %v61_v0, %v63_v15  ;;  %v180_v15 = vld [vmem:[%s471_s2] sm:$0xff] }
  0x1e   :  { %v76_v47 = vand.u32 65535, %v72_v46  ;;  %v77_v48 = vshrl.u32 %v72_v46, 16  ;;  %v118_v27 = vmul.u32 %v415_v31, %v64_v23  ;;  %vm168_vm4 = vweird.f32 %v406_v3 }
  0x1f   :  { %v100_v55 = vmul.u32 %v98_v49, %v74_v43  ;;  %v101_v56 = vmul.u32 %v99_v50, %v74_v43  ;;  %v102_v57 = vmul.u32 %v98_v49, %v75_v44  ;;  %v103_v61 = vmul.u32 %v99_v50, %v75_v44 }
  0x20   :  { %v78_v52 = vmul.u32 %v76_v47, %v74_v43  ;;  %v79_v53 = vmul.u32 %v77_v48, %v74_v43  ;;  %v80_v54 = vmul.u32 %v76_v47, %v75_v44  ;;  %v81_v58 = vmul.u32 %v77_v48, %v75_v44 }
  0x21   :  { %v104_v62 = vshll.u32 %v101_v56, 16  ;;  %v106_v63 = vshll.u32 %v102_v57, 16  ;;  %v105_v12 = vshrl.u32 %v101_v56, 16  ;;  %v107_v19 = vshrl.u32 %v102_v57, 16 }
  0x22   :  { %v82_v59 = vshll.u32 %v79_v53, 16  ;;  %v84_v60 = vshll.u32 %v80_v54, 16  ;;  %v83_v8 = vshrl.u32 %v79_v53, 16  ;;  %v85_v16 = vshrl.u32 %v80_v54, 16 }
  0x23   :  { %vm108_vm6 = vc.u32 %v100_v55, %v104_v62  ;;  %v110_v7 = vadd.s32 %v104_v62, %v100_v55 }
  0x24   :  { %vm86_vm5 = vc.u32 %v78_v52, %v82_v59  ;;  %v88_v1 = vadd.s32 %v82_v59, %v78_v52  ;;  %v109_v10 = vsel %vm108_vm6, 1, %v372_v4 }
  0x25   :  { %v87_v5 = vsel %vm86_vm5, 1, %v372_v4  ;;  %v111_v14 = vadd.s32 %v109_v10, %v103_v61  ;;  %vm112_vm8 = vc.u32 %v110_v7, %v106_v63  ;;  %v114_v22 = vadd.s32 %v110_v7, %v106_v63 }
  0x26   :  { %v89_v9 = vadd.s32 %v87_v5, %v81_v58  ;;  %vm90_vm7 = vc.u32 %v88_v1, %v84_v60  ;;  %v113_v18 = vsel %vm112_vm8, 1, %v372_v4 }
  0x27   :  { %v91_v11 = vsel %vm90_vm7, 1, %v372_v4  ;;  %v115_v20 = vadd.s32 %v113_v18, %v111_v14  ;;  %v341_v18 = vld [vmem:[%s472_s3] sm:$0xff] }
  0x28   :  { %v93_v17 = vadd.s32 %v91_v11, %v89_v9 }
  0x29   :  { %v116_v24 = vadd.s32 %v115_v20, %v105_v12 }
  0x2a   :  { %v94_v21 = vadd.s32 %v93_v17, %v83_v8 }
  0x2b   :  { %v117_v26 = vadd.s32 %v116_v24, %v107_v19 }
  0x2c   :  { %v95_v25 = vadd.s32 %v94_v21, %v85_v16  ;;  %v181_v16 = vstv %s470_s0 }
  0x2d   :  { %v121_v28 = vadd.s32 1, %v117_v26  ;;  %v342_v24 = vmul.f32 %v341_v18, %v181_v16 }
  0x2e   :  { %vm120_vm9 = vc.u32 %v95_v25, %v114_v22  ;;  %v119_v13 = vadd.s32 %v114_v22, %v95_v25  ;;  %v182_v22 = vmul.f32 %v181_v16, %v180_v15 }
  0x2f   :  { %v122_v29 = vsel %vm120_vm9, %v121_v28, %v117_v26 }
  0x30   :  { %v123_v30 = vadd.s32 %v122_v29, %v118_v27 }
  0x32   :  { %v124_v32 = vadd.s32 536870912, %v123_v30 }
  0x34   :  { %v125_v33 = vshrl.u32 %v124_v32, 30 }
  0x36   :  { %v126_v34 = vshll.u32 %v125_v33, 30  ;;  %v149_v51 = vsub.s32 4, %v125_v33 }
  0x38   :  { %v127_v35 = vsub.s32 %v123_v30, %v126_v34  ;;  %v150_v54 = vsel %vm27_vm12, %v149_v51, %v125_v33 }
  0x39   :  { %v152_v57 = vsel %vm26_vm13, 0, %v150_v54 }
  0x3a   :  { %vm128_vm10 = vcmp.lt.s32.totalorder %v127_v35, 0  ;;  %v129_v36 = vsub.s32 0, %v127_v35  ;;  %v329_v62 = vadd.s32 3, %v152_v57  ;;  %v169_v4 = vand.u32 3, %v152_v57 }
  0x3c   :  { %v130_v37 = vsel %vm128_vm10, %v129_v36, %v127_v35  ;;  %v330_v5 = vand.u32 3, %v329_v62  ;;  %vm174_vm14 = vcmp.eq.s32.totalorder %v169_v4, 2  ;;  %vm170_vm0 = vcmp.lt.s32.totalorder %v169_v4, 2 }
  0x3d   :  { %v131_v38 = vclz %v130_v37  ;;  %vm171_vm1 = vcmp.eq.s32.totalorder %v169_v4, 0 }
  0x3e   :  { %vm335_vm15 = vcmp.eq.s32.totalorder %v330_v5, 2  ;;  %vm331_vm2 = vcmp.lt.s32.totalorder %v330_v5, 2  ;;  %vm332_vm3 = vcmp.eq.s32.totalorder %v330_v5, 0 }
  0x3f   :  { %v354_v39 = vadd.s32 4294967294, %v131_v38 }
  0x41   :  { %vm355_vm11 = vcmp.lt.s32.totalorder %v354_v39, 0 }
  0x42   :  { %v134_v40 = vsel %vm355_vm11, 0, %v354_v39 }
  0x43   :  { %v135_v41 = vsub.s32 32, %v134_v40  ;;  %v136_v42 = vshll.u32 %v127_v35, %v134_v40  ;;  %v139_v43 = vsub.s32 4294967266, %v134_v40 }
  0x45   :  { %v137_v31 = vshrl.u32 %v119_v13, %v135_v41  ;;  %v140_v44 = vadd.s32 127, %v139_v43 }
  0x47   :  { %v138_v45 = vor.u32 %v137_v31, %v136_v42  ;;  %v141_v46 = vshll.u32 %v140_v44, 23 }
  0x49   :  { %v142_v47 = vor.u32 4788187, %v141_v46  ;;  %v145_v48 = vcvt.s32.f32 %v138_v45 }
  0x4b   :  { %v143_v49 = vand.u32 2147483647, %v142_v47 }
  0x4d   :  { %v146_v50 = vmul.f32 %v145_v48, %v143_v49 }
  0x4f   :  { %v147_v52 = vxor.u32 2147483648, %v146_v50 }
  0x51   :  { %v148_v53 = vsel %vm27_vm12, %v147_v52, %v146_v50 }
  0x52   :  { %v151_v55 = vsel %vm26_vm13, %v406_v3, %v148_v53 }
  0x53   :  { %v153_v56 = vmul.f32 %v151_v55, %v151_v55 }
  0x55   :  { %v154_v58 = vmul.f32 -0.001358992, %v153_v56  ;;  %v161_v59 = vmul.f32 -0.00019511016, %v153_v56 }
  0x57   :  { %v155_v60 = vadd.f32 0.041655596, %v154_v58  ;;  %v162_v61 = vadd.f32 0.008332121, %v161_v59 }
  0x59   :  { %v156_v63 = vmul.f32 %v155_v60, %v153_v56  ;;  %v163_v0 = vmul.f32 %v162_v61, %v153_v56 }
  0x5b   :  { %v157_v1 = vadd.f32 -0.4999988, %v156_v63  ;;  %v164_v2 = vadd.f32 -0.16666654, %v163_v0 }
  0x5d   :  { %v158_v7 = vmul.f32 %v157_v1, %v153_v56  ;;  %v165_v6 = vmul.f32 %v164_v2, %v153_v56 }
  0x5f   :  { %v159_v8 = vadd.f32 1.0, %v158_v7  ;;  %v166_v9 = vadd.f32 1.0, %v165_v6 }
  0x61   :  { %v167_v10 = vmul.f32 %v166_v9, %v151_v55  ;;  %v175_v11 = vxor.u32 2147483648, %v159_v8 }
  0x63   :  { %v172_v12 = vxor.u32 2147483648, %v167_v10  ;;  %v176_v14 = vsel %vm174_vm14, %v175_v11, %v167_v10  ;;  %v337_v17 = vsel %vm335_vm15, %v175_v11, %v167_v10 }
  0x65   :  { %v173_v19 = vsel %vm171_vm1, %v159_v8, %v172_v12  ;;  %v334_v20 = vsel %vm332_vm3, %v159_v8, %v172_v12 }
  0x66   :  { %v177_v21 = vsel %vm170_vm0, %v173_v19, %v176_v14  ;;  %v338_v23 = vsel %vm331_vm2, %v334_v20, %v337_v17 }
  0x67   :  { %v178_v25 = vsel %vm168_vm4, nan, %v177_v21  ;;  %v339_v26 = vsel %vm168_vm4, nan, %v338_v23 }
  0x68   :  { %v179_v27 = vmul.f32 %v178_v25, %v406_v3  ;;  %v340_v28 = vmul.f32 %v339_v26, %v406_v3 }
  0x6a   :  { %v183_v29 = vadd.f32 %v182_v22, %v179_v27  ;;  %v343_v30 = vadd.f32 %v342_v24, %v340_v28 }
  0x6c   :  { %184 = vst [vmem:[%s473_s4] sm:$0xff] %v183_v29 }
  0x6d   :  { %344 = vst [vmem:[%s474_s5] sm:$0xff] %v343_v30 }

</bundles_post_ra>
